<compile_context>
chip_gen: v7x
topology: tpu7x:2x2x1
jax: 0.10.0
libtpu: 0.0.40
codegen_flags: <defaults>
</compile_context>

<pallas_src>
import functools

import numpy as np
import jax
import jax.numpy as jnp
from jax.experimental import pallas as pl
from jax.experimental.pallas import tpu as pltpu


def _round_up(v, m):
    return (v + m - 1) // m * m


def _conv_rows(x_ref, w_ref, kh, tile_h):
    """conv of `tile_h` output rows as kh accumulating (tile_h,K)@(K,WC_p) matmuls."""
    acc = jax.lax.dot_general(
        x_ref[0:tile_h, :], w_ref[0],
        (((1,), (0,)), ((), ())), preferred_element_type=jnp.float32)
    for dh in range(1, kh):
        acc = acc + jax.lax.dot_general(
            x_ref[dh:dh + tile_h, :], w_ref[dh],
            (((1,), (0,)), ((), ())), preferred_element_type=jnp.float32)
    return acc                                              # (tile_h, WC_p) f32


# -----------------------------------------------------------------------------
# Pass 1: recompute-style conv tile -> per-tile BN sufficient statistics only
# -----------------------------------------------------------------------------
def _conv_stats_kernel(x_ref, w_ref, sel_ref, stats_ref, *,
                       kh, tile_h, h_out, mask_rows):
    # x_ref    : (tile_h + kh - 1, K_p)  halo window of flattened padded rows
    # w_ref    : (kh, K_p, WC_p)         lowered banded weights
    # sel_ref  : (WC_p, Cout_p)          folds (w, co) lanes back onto channels
    # stats_ref: (2, Cout_p)             per-tile [sum, sum_sq] per channel
    acc = _conv_rows(x_ref, w_ref, kh, tile_h)

    if mask_rows:                                           # H padded to tile_h mult
        row = (jax.lax.broadcasted_iota(jnp.int32, (tile_h, 1), 0)
               + pl.program_id(1) * tile_h)
        acc = jnp.where(row < h_out, acc, 0.0)

    s1 = jnp.sum(jax.lax.dot_general(
        acc, sel_ref[...], (((1,), (0,)), ((), ())),
        preferred_element_type=jnp.float32), axis=0, keepdims=True)
    s2 = jnp.sum(jax.lax.dot_general(
        acc * acc, sel_ref[...], (((1,), (0,)), ((), ())),
        preferred_element_type=jnp.float32), axis=0, keepdims=True)
    stats_ref[...] = jnp.concatenate([s1, s2], axis=0)      # (2, Cout_p)


# -----------------------------------------------------------------------------
# Pass 2: recompute conv + fused per-channel scale/shift (bias+BN folded) + ReLU
# -----------------------------------------------------------------------------
def _conv_bn_relu_kernel(x_ref, w_ref, scale_ref, shift_ref, out_ref, *,
                         kh, tile_h):
    # scale/shift_ref : (1, WC_p) f32 in the flat (w*Cout+co) lane layout
    acc = _conv_rows(x_ref, w_ref, kh, tile_h)              # f32
    out_ref[...] = jnp.maximum(acc * scale_ref[...] + shift_ref[...], 0.0)


# -----------------------------------------------------------------------------
# Wrapper
# -----------------------------------------------------------------------------
def conv_block_forward(x_nchw, weight, bias, gamma, beta, *, padding=1,
                       eps=1e-5, compute_dtype=jnp.bfloat16):
    """ConvBlock forward (conv -> training-mode BN -> ReLU), stride 1.

    x_nchw: (N, Cin, H, W); weight: (Cout, Cin, KH, KW); bias/gamma/beta: (Cout,).
    `bias` is accepted for API fidelity but not used: under training-mode BatchNorm
    the conv bias cancels exactly in the mean subtraction.
    compute_dtype=bfloat16 (default) feeds bf16 operands to the MXU (v6e/v7x);
    accumulation, BN statistics and the FMA+ReLU epilogue are always f32 (v5e path).
    """
    del bias  # mathematically a no-op under training-mode BN

    N, Cin, H, W = x_nchw.shape
    Cout, _, KH, KW = weight.shape
    Wp = W + 2 * padding
    H_out = H + 2 * padding - KH + 1
    W_out = Wp - KW + 1

    WC = W_out * Cout
    WC_p = _round_up(WC, 128)             # lane-dense output minor dim
    K = Wp * Cin
    K_p = _round_up(K, 8)                 # contraction/sublane dim of lowered weights
    Cout_p = _round_up(Cout, 128)         # lanes of the tiny stats vectors only

    # ---- h-tile: multiple of 8, sized against a ~2 MiB per-tile output budget ----
    tile_h = min(512, max(8, (2 * 2 ** 20) // (WC_p * 4)))
    tile_h -= tile_h % 8
    tile_h = min(tile_h, _round_up(H_out, 8))
    n_ht = -(-H_out // tile_h)
    H_pad = n_ht * tile_h                 # pad H (never "whole image in one tile")
    th_halo = tile_h + KH - 1
    mask_rows = H_pad != H_out

    # ---- one-time weight lowering: banded block-Toeplitz matrix per kh ----
    # Wl[dh, wq*Cin+ci, w*Cout+co] = weight[co, ci, dh, wq-w]  (0 <= wq-w < KW)
    # so `rows @ Wl[dh]` lands directly in the lane-dense (h, w*Cout+co) layout.
    # TODO(synk): for large W*Cin / W*Cout, tile the lowered weights along W
    # (block-Toeplitz per W tile) instead of materializing the full band.
    w_t = jnp.transpose(weight, (2, 3, 1, 0))               # (KH, KW, Cin, Cout)
    toe = np.zeros((KW, Wp, W_out), np.float32)
    for dw in range(KW):
        toe[dw, dw:dw + W_out, :] = np.eye(W_out, dtype=np.float32)
    wl = jnp.einsum("dqw,kdio->kqiwo", jnp.asarray(toe), w_t)   # (KH,Wp,Cin,W_out,Cout)
    wl = wl.reshape(KH, K, WC)
    wl = jnp.pad(wl, ((0, 0), (0, K_p - K), (0, WC_p - WC))).astype(compute_dtype)

    # selection matrix: fold the (w, co) output lanes back onto channels for stats
    sel_np = np.zeros((WC_p, Cout_p), np.float32)
    sel_np[np.arange(WC), np.arange(WC) % Cout] = 1.0
    sel = jnp.asarray(sel_np)

    # ---- activations: NCHW -> flattened, zero-padded rows with minor dim Wp*Cin ----
    # TODO(synk): fold this transpose+pad (and the final NHWC->NCHW transpose) into
    # the kernel DMAs / keep the surrounding model NHWC end-to-end to drop the extra
    # HBM passes over the activations.
    x_nhwc = jnp.transpose(x_nchw, (0, 2, 3, 1))
    x_pad = jnp.pad(
        x_nhwc,
        ((0, 0), (padding, padding + (H_pad - H_out)), (padding, padding), (0, 0)))
    x_flat = jnp.pad(x_pad.reshape(N, H_pad + KH - 1, K),
                     ((0, 0), (0, 0), (0, K_p - K))).astype(compute_dtype)
    # overlapping halo row-windows per h-tile: per-step input VMEM independent of H
    win_idx = (np.arange(n_ht)[:, None] * tile_h
               + np.arange(th_halo)[None, :])                # (n_ht, th_halo)
    x_win = x_flat[:, jnp.asarray(win_idx), :]               # (N, n_ht, th_halo, K_p)

    # ---- explicit VMEM budget (v7x has only 64 MiB physical) ----
    dsz = jnp.dtype(compute_dtype).itemsize
    vmem_need = (2 * th_halo * K_p * dsz        # halo input window (double-buffered)
                 + KH * K_p * WC_p * dsz        # lowered weights (resident)
                 + WC_p * Cout_p * 4            # stats selection matrix
                 + 2 * tile_h * WC_p * 4        # f32 accumulator / output tile
                 + 4 * Cout_p * 4) + (1 << 20)
    cparams = pltpu.CompilerParams(
        dimension_semantics=("parallel", "parallel"),
        vmem_limit_bytes=int(min(32 * 2 ** 20, max(16 * 2 ** 20, 2 * vmem_need))),
    )

    grid = (N, n_ht)

    # -------- pass 1: conv recomputation -> per-tile BN partial sums only --------
    stats = pl.pallas_call(
        functools.partial(_conv_stats_kernel, kh=KH, tile_h=tile_h,
                          h_out=H_out, mask_rows=mask_rows),
        out_shape=jax.ShapeDtypeStruct((N, n_ht, 2, Cout_p), jnp.float32),
        grid=grid,
        in_specs=[
            pl.BlockSpec((None, None, th_halo, K_p), lambda b, t: (b, t, 0, 0)),
            pl.BlockSpec((KH, K_p, WC_p), lambda b, t: (0, 0, 0)),
            pl.BlockSpec((WC_p, Cout_p), lambda b, t: (0, 0)),
        ],
        out_specs=pl.BlockSpec((None, None, 2, Cout_p), lambda b, t: (b, t, 0, 0)),
        compiler_params=cparams,
    )(x_win, wl, sel)

    # ---- tiny cross-tile/cross-core stats combine + BN fold (Cout-sized glue) ----
    count = float(N * H_out * W_out)
    s1 = jnp.sum(stats[:, :, 0, :Cout], axis=(0, 1))
    s2 = jnp.sum(stats[:, :, 1, :Cout], axis=(0, 1))
    mean = s1 / count
    # NOTE: single-pass E[x^2]-E[x]^2 in f32; adequate here, switch to centered
    # per-tile partials if |mean| >> std in a training setting.
    var = jnp.maximum(s2 / count - mean * mean, 0.0)         # biased (training) var
    scale = gamma.astype(jnp.float32) * jax.lax.rsqrt(var + eps)
    shift = beta.astype(jnp.float32) - mean * scale
    scale_flat = jnp.pad(jnp.tile(scale, W_out), (0, WC_p - WC)).reshape(1, WC_p)
    shift_flat = jnp.pad(jnp.tile(shift, W_out), (0, WC_p - WC)).reshape(1, WC_p)

    # -------- pass 2: recompute conv + fused scale/shift + ReLU (lane-dense out) ----
    out_flat = pl.pallas_call(
        functools.partial(_conv_bn_relu_kernel, kh=KH, tile_h=tile_h),
        out_shape=jax.ShapeDtypeStruct((N, H_pad, WC_p), jnp.float32),
        grid=grid,
        in_specs=[
            pl.BlockSpec((None, None, th_halo, K_p), lambda b, t: (b, t, 0, 0)),
            pl.BlockSpec((KH, K_p, WC_p), lambda b, t: (0, 0, 0)),
            pl.BlockSpec((1, WC_p), lambda b, t: (0, 0)),
            pl.BlockSpec((1, WC_p), lambda b, t: (0, 0)),
        ],
        out_specs=pl.BlockSpec((None, tile_h, WC_p), lambda b, t: (b, t, 0)),
        compiler_params=cparams,
    )(x_win, wl, scale_flat, shift_flat)

    # Drop H/lane padding (no-op when already aligned), back to NCHW (PyTorch API).
    out = out_flat[:, :H_out, :WC].reshape(N, H_out, W_out, Cout)
    return jnp.transpose(out, (0, 3, 1, 2))


# -----------------------------------------------------------------------------
# Pure-JAX reference (conv + bias + training-mode BN + ReLU)
# -----------------------------------------------------------------------------
def _reference(x_nchw, weight, bias, gamma, beta, padding=1, eps=1e-5):
    x_nhwc = jnp.transpose(x_nchw, (0, 2, 3, 1))
    w_hwio = jnp.transpose(weight, (2, 3, 1, 0))
    out = jax.lax.conv_general_dilated(
        x_nhwc, w_hwio, window_strides=(1, 1),
        padding=[(padding, padding), (padding, padding)],
        dimension_numbers=("NHWC", "HWIO", "NHWC"),
    ) + bias[None, None, None, :]
    mean = jnp.mean(out, axis=(0, 1, 2), keepdims=True)
    var = jnp.mean((out - mean) ** 2, axis=(0, 1, 2), keepdims=True)
    out = (out - mean) * jax.lax.rsqrt(var + eps) * gamma + beta
    out = jnp.maximum(out, 0.0)
    return jnp.transpose(out, (0, 3, 1, 2))


if __name__ == "__main__":
    # ConvBlock(cin=4, cout=8, ks=3, stride=1, padding=1) on a small input.
    N, Cin, Cout, H, W = 2, 4, 8, 16, 16
    KH = KW = 3

    key = jax.random.PRNGKey(0)
    k1, k2, k3 = jax.random.split(key, 3)

    fan_in = Cin * KH * KW
    bound = 1.0 / (fan_in ** 0.5)
    conv_w = jax.random.uniform(k1, (Cout, Cin, KH, KW), jnp.float32, -bound, bound)
    conv_b = jax.random.uniform(k2, (Cout,), jnp.float32, -bound, bound)
    bn_gamma = jnp.ones((Cout,), jnp.float32)    # nn.BatchNorm2d default weight
    bn_beta = jnp.zeros((Cout,), jnp.float32)    # nn.BatchNorm2d default bias

    x = jax.random.normal(k3, (N, Cin, H, W), jnp.float32)

    ref = _reference(x, conv_w, conv_b, bn_gamma, bn_beta, padding=1)

    # f32-operand path: exact parity with the f32 reference (v5e-style path).
    out_f32 = conv_block_forward(x, conv_w, conv_b, bn_gamma, bn_beta,
                                 padding=1, compute_dtype=jnp.float32)
    out_f32 = jax.block_until_ready(out_f32)
    assert out_f32.shape == (N, Cout, H, W)
    assert jnp.allclose(out_f32, ref, atol=1e-4, rtol=1e-4), "f32 mismatch vs reference"

    # Default bf16 MXU-operand path (v6e/v7x); accumulation/stats/epilogue stay f32.
    out_bf16 = conv_block_forward(x, conv_w, conv_b, bn_gamma, bn_beta, padding=1)
    out_bf16 = jax.block_until_ready(out_bf16)
    assert out_bf16.shape == (N, Cout, H, W)
    assert jnp.allclose(out_bf16, ref, atol=5e-2, rtol=5e-2), "bf16 mismatch vs reference"

    print("KERNEL_OK")
</pallas_src>

<mosaic_0001>
module attributes {stable_mosaic.version = 11 : i64} {
  func.func @_conv_stats_kernel(%arg0: i32, %arg1: i32, %arg2: memref<1x1x18x72xf32, #tpu.memory_space<vmem>>, %arg3: memref<3x72x128xf32, #tpu.memory_space<vmem>>, %arg4: memref<128x128xf32, #tpu.memory_space<vmem>>, %arg5: memref<1x1x2x128xf32, #tpu.memory_space<vmem>>) attributes {dimension_semantics = [#tpu.dimension_semantics<parallel>, #tpu.dimension_semantics<parallel>], iteration_bounds = array<i64: 2, 1>, scalar_prefetch = 0 : i64, scratch_operands = 0 : i64, tpu.core_type = #tpu.core_type<tc>, window_params = [{transform_indices = @transform_0, window_bounds = array<i64: 1, 1, 18, 72>}, {pipeline_mode = #tpu.pipeline_mode<synchronous>, transform_indices = @transform_1, window_bounds = array<i64: 3, 72, 128>}, {pipeline_mode = #tpu.pipeline_mode<synchronous>, transform_indices = @transform_2, window_bounds = array<i64: 128, 128>}, {transform_indices = @transform_3, window_bounds = array<i64: 1, 1, 2, 128>}]} {
    %c0 = arith.constant 0 : index
    %c0_0 = arith.constant 0 : index
    %c0_1 = arith.constant 0 : index
    %c0_2 = arith.constant 0 : index
    %0 = vector.load %arg2[%c0, %c0_0, %c0_1, %c0_2] : memref<1x1x18x72xf32, #tpu.memory_space<vmem>>, vector<1x1x16x72xf32>
    %1 = vector.shape_cast %0 : vector<1x1x16x72xf32> to vector<16x72xf32>
    %c0_3 = arith.constant 0 : index
    %c0_4 = arith.constant 0 : index
    %c0_5 = arith.constant 0 : index
    %2 = vector.load %arg3[%c0_3, %c0_4, %c0_5] : memref<3x72x128xf32, #tpu.memory_space<vmem>>, vector<1x72x128xf32>
    %3 = vector.shape_cast %2 : vector<1x72x128xf32> to vector<72x128xf32>
    %cst = arith.constant dense<0.000000e+00> : vector<16x128xf32>
    %4 = tpu.matmul %1, %3, %cst {dimension_numbers = #tpu.dot_dimension_numbers<[1], [0], [0], [1], [0, 0, 1, 1], [], []>} : vector<16x72xf32>, vector<72x128xf32>, vector<16x128xf32> -> vector<16x128xf32>
    %c0_6 = arith.constant 0 : index
    %c0_7 = arith.constant 0 : index
    %c1 = arith.constant 1 : index
    %c0_8 = arith.constant 0 : index
    %5 = vector.load %arg2[%c0_6, %c0_7, %c1, %c0_8] : memref<1x1x18x72xf32, #tpu.memory_space<vmem>>, vector<1x1x16x72xf32>
    %6 = vector.shape_cast %5 : vector<1x1x16x72xf32> to vector<16x72xf32>
    %c1_9 = arith.constant 1 : index
    %c0_10 = arith.constant 0 : index
    %c0_11 = arith.constant 0 : index
    %7 = vector.load %arg3[%c1_9, %c0_10, %c0_11] : memref<3x72x128xf32, #tpu.memory_space<vmem>>, vector<1x72x128xf32>
    %8 = vector.shape_cast %7 : vector<1x72x128xf32> to vector<72x128xf32>
    %cst_12 = arith.constant dense<0.000000e+00> : vector<16x128xf32>
    %9 = tpu.matmul %6, %8, %cst_12 {dimension_numbers = #tpu.dot_dimension_numbers<[1], [0], [0], [1], [0, 0, 1, 1], [], []>} : vector<16x72xf32>, vector<72x128xf32>, vector<16x128xf32> -> vector<16x128xf32>
    %10 = arith.addf %4, %9 : vector<16x128xf32>
    %c0_13 = arith.constant 0 : index
    %c0_14 = arith.constant 0 : index
    %c2 = arith.constant 2 : index
    %c0_15 = arith.constant 0 : index
    %11 = vector.load %arg2[%c0_13, %c0_14, %c2, %c0_15] : memref<1x1x18x72xf32, #tpu.memory_space<vmem>>, vector<1x1x16x72xf32>
    %12 = vector.shape_cast %11 : vector<1x1x16x72xf32> to vector<16x72xf32>
    %c2_16 = arith.constant 2 : index
    %c0_17 = arith.constant 0 : index
    %c0_18 = arith.constant 0 : index
    %13 = vector.load %arg3[%c2_16, %c0_17, %c0_18] : memref<3x72x128xf32, #tpu.memory_space<vmem>>, vector<1x72x128xf32>
    %14 = vector.shape_cast %13 : vector<1x72x128xf32> to vector<72x128xf32>
    %cst_19 = arith.constant dense<0.000000e+00> : vector<16x128xf32>
    %15 = tpu.matmul %12, %14, %cst_19 {dimension_numbers = #tpu.dot_dimension_numbers<[1], [0], [0], [1], [0, 0, 1, 1], [], []>} : vector<16x72xf32>, vector<72x128xf32>, vector<16x128xf32> -> vector<16x128xf32>
    %16 = arith.addf %10, %15 : vector<16x128xf32>
    %c0_20 = arith.constant 0 : index
    %c0_21 = arith.constant 0 : index
    %17 = vector.load %arg4[%c0_20, %c0_21] : memref<128x128xf32, #tpu.memory_space<vmem>>, vector<128x128xf32>
    %cst_22 = arith.constant dense<0.000000e+00> : vector<16x128xf32>
    %18 = tpu.matmul %16, %17, %cst_22 {dimension_numbers = #tpu.dot_dimension_numbers<[1], [0], [0], [1], [0, 0, 1, 1], [], []>} : vector<16x128xf32>, vector<128x128xf32>, vector<16x128xf32> -> vector<16x128xf32>
    %cst_23 = arith.constant dense<0.000000e+00> : vector<128xf32>
    %19 = vector.multi_reduction <add>, %18, %cst_23 [0] : vector<16x128xf32> to vector<128xf32>
    %20 = vector.shape_cast %19 : vector<128xf32> to vector<1x128xf32>
    %21 = arith.mulf %16, %16 : vector<16x128xf32>
    %c0_24 = arith.constant 0 : index
    %c0_25 = arith.constant 0 : index
    %22 = vector.load %arg4[%c0_24, %c0_25] : memref<128x128xf32, #tpu.memory_space<vmem>>, vector<128x128xf32>
    %cst_26 = arith.constant dense<0.000000e+00> : vector<16x128xf32>
    %23 = tpu.matmul %21, %22, %cst_26 {dimension_numbers = #tpu.dot_dimension_numbers<[1], [0], [0], [1], [0, 0, 1, 1], [], []>} : vector<16x128xf32>, vector<128x128xf32>, vector<16x128xf32> -> vector<16x128xf32>
    %cst_27 = arith.constant dense<0.000000e+00> : vector<128xf32>
    %24 = vector.multi_reduction <add>, %23, %cst_27 [0] : vector<16x128xf32> to vector<128xf32>
    %25 = vector.shape_cast %24 : vector<128xf32> to vector<1x128xf32>
    %26 = tpu.concatenate %20, %25 in 0 : vector<1x128xf32>, vector<1x128xf32> -> vector<2x128xf32>
    %c0_28 = arith.constant 0 : index
    %c0_29 = arith.constant 0 : index
    %c0_30 = arith.constant 0 : index
    %c0_31 = arith.constant 0 : index
    %27 = vector.load %arg5[%c0_28, %c0_29, %c0_30, %c0_31] : memref<1x1x2x128xf32, #tpu.memory_space<vmem>>, vector<1x1x2x128xf32>
    %28 = vector.shape_cast %27 : vector<1x1x2x128xf32> to vector<2x128xf32>
    %29 = vector.shape_cast %26 : vector<2x128xf32> to vector<1x1x2x128xf32>
    tpu.vector_store %arg5[%c0_28, %c0_29, %c0_30, %c0_31], %29 {strides = array<i32>} : memref<1x1x2x128xf32, #tpu.memory_space<vmem>>, vector<1x1x2x128xf32>,
    return
  }
  func.func @transform_0(%arg0: i32, %arg1: i32) -> (i32, i32, i32, i32) {
    %c0_i32 = arith.constant 0 : i32
    %c0_i32_0 = arith.constant 0 : i32
    %c0_i32_1 = arith.constant 0 : i32
    return %arg0, %arg1, %c0_i32, %c0_i32_0 : i32, i32, i32, i32
  }
  func.func @transform_1(%arg0: i32, %arg1: i32) -> (i32, i32, i32) {
    %c0_i32 = arith.constant 0 : i32
    %c0_i32_0 = arith.constant 0 : i32
    %c0_i32_1 = arith.constant 0 : i32
    %c0_i32_2 = arith.constant 0 : i32
    return %c0_i32, %c0_i32_0, %c0_i32_1 : i32, i32, i32
  }
  func.func @transform_2(%arg0: i32, %arg1: i32) -> (i32, i32) {
    %c0_i32 = arith.constant 0 : i32
    %c0_i32_0 = arith.constant 0 : i32
    %c0_i32_1 = arith.constant 0 : i32
    return %c0_i32, %c0_i32_0 : i32, i32
  }
  func.func @transform_3(%arg0: i32, %arg1: i32) -> (i32, i32, i32, i32) {
    %c0_i32 = arith.constant 0 : i32
    %c0_i32_0 = arith.constant 0 : i32
    %c0_i32_1 = arith.constant 0 : i32
    return %arg0, %arg1, %c0_i32, %c0_i32_0 : i32, i32, i32, i32
  }
}

</mosaic_0001>

<bundles_post_ra>
// kernel: tpu_custom_call.1
= control target key start
LH: loop header
LB: loop body
LE: loop exit
PB: predicated region body
PF: predicated region fallthrough
CT: control target
= control target key end

     0   :  { %8 = vsyncpa [#allocation3], 0  ;;  %s1631_s0 = inlined_call_operand.vmem [shape: f32[2,1,18,72], index: 0, kind: input, shape index: {}]   ;;  %s1632_s1 = inlined_call_operand.hbm [shape: f32[3,72,128], index: 1, kind: input, shape index: {}]   ;;  %s1633_s2 = inlined_call_operand.hbm [shape: f32[128,128], index: 2, kind: input, shape index: {}]   ;;  %s1634_s3 = inlined_call_operand.hbm [shape: f32[2,1,2,128], index: 3, kind: output, shape index: {}]  }
   0x1   :  { %9 = vsyncpa [#allocation6], 0 }
   0x2   :  { %10 = vsyncpa [#allocation4], 0 }
   0x3   :  { %12 = vsyncpa [#allocation4 + $0x1], 0  ;;  %s1394_s12 = smov 0   ;;  %s1396_s13 = smov 0  }
   0x4   :  { %s1398_s14 = smov 0   ;;  %s1400_s15 = smov 0  }
   0x5   :  { %s1402_s16 = smov 0   ;;  %s1404_s17 = smov 0  }
   0x6 LB: > { %s807_s18 = sadd.s32 4294967295, %s1367_s17   ;;  %s808_s19 = sadd.s32 4294967294, %s1367_s17   ;;  %s1367_s17 = sphi %s1404_s17, %s18_s17   ;;  %s1363_s16 = sphi %s1402_s16, %s1652_s16   ;;  %s1359_s15 = sphi %s1400_s15, %s1651_s15   ;;  %s1355_s14 = sphi %s1398_s14, %s1650_s14   ;;  %s1351_s13 = sphi %s1396_s13, %s1649_s13   ;;  %s1347_s12 = sphi %s1394_s12, %s1648_s12  }
   0x7   : > { %s30_s20 = sadd.s32 1, %s1363_s16  ;;  %s109_s21 = sadd.s32 1, %s1355_s14 }
   0x8   : > { %p32_p0 = scmp.ge.s32.totalorder %s30_s20, 2  ;;  %p119_p1 = scmp.ne.s32.totalorder %s1355_s14, %s1351_s13 }
   0x9   : > { %p120_p2 = scmp.eq.s32.totalorder %s807_s18, 1  ;;  %p125_p3 = scmp.ne.s32.totalorder %s1351_s13, %s1347_s12 }
   0xa   : > { %s1654_s20 = smov (%p32_p0, %s30_s20), 0  ;;  %p126_p5 = scmp.eq.s32.totalorder %s808_s19, 1 }
   0xb   : > { %p1434_p4 = por %p120_p2, %p119_p1  ;;  %s104_s23 = ssub.s32 %s1363_s16, %s1654_s20 }
   0xc   : > { %p809_p6 = scmp.ge.s32.totalorder %s1367_s17, 1  ;;  %p107_p7 = scmp.eq.s32.totalorder %s104_s23, 0 }
   0xd   : > { %s1639_s22 = scalar_select %p1434_p4, 1, 0 }
   0xe   : > { %p1441_p8 = por %p126_p5, %p125_p3  ;;  %p133_p9 = scmp.lt.s32.totalorder %s1367_s17, 3 }
   0xf   : > { %s1447_s25 = scalar_select %p107_p7, %s1355_s14, %s109_s21  }
  0x10   : > { %s1640_s24 = scalar_select %p1441_p8, 1, 0 }
  0x11   : > { %p1449_p10 = pnand %p809_p6, %p133_p9  ;;  %p1453_p11 = scmp.eq.s32.totalorder %s807_s18, 0 }
  0x12   : > { %s1369_s28 = smov [#allocation2]   ;;  %s1370_s4 = smov [#allocation5]  }
  0x13   : > { %s1641_s26 = scalar_select %p1449_p10, 1, 0 }
  0x14   : > { %s1642_s27 = scalar_select %p1453_p11, 1, 0 }
  0x15   : > { %p1157_p12 = pneg %p1449_p10  ;;  %s145_s29 = sshll.u32 %s1369_s28, 4  ;;  %s146_s29 = int_to_ptr.vmem [resolvable:$true] %s145_s29 }
  0x16   : > { %s158_s5 = sshll.u32 %s1370_s4, 4  ;;  %s1225_s8 = scalar_lea.hbm %s1632_s1, 3456  ;;  %s1465_s5 = int_to_ptr.vmem [resolvable:$true] %s158_s5 }
  0x17   : > { %p1461_p13 = pnand %p1453_p11, %p1157_p12  ;;  %p1226_p0 = scmp.ne.s32.totalorder %s1632_s1, %s1225_s8 }
  0x18   : > { %p1232_p5 = scmp.lt.u32.totalorder %s1225_s8, %s1632_s1 }
  0x19   : > { %p1227_p1 = pneg %p1461_p13 }
  0x1b   : > { %p1228_p2 = pnand %p1227_p1, %p1226_p0 }
  0x1d   : > { %p1229_p3 = pneg %p1228_p2 }
  0x1f   : > { %p1234_p6 = pnand %p1232_p5, %p1229_p3 }
  0x21   : > { %1237 = shalt.err (!%p1234_p6)
}
  0x22   : > { %s1238_s19 = scalar_lea.vmem %s146_s29, 3456  ;;  %p1246_p8 = scmp.lt.s32.totalorder %s146_s29, %s146_s29 }
  0x23   : > { %p1239_p7 = scmp.ne.s32.totalorder %s146_s29, %s1238_s19  ;;  %p1247_p4 = scmp.lt.s32.totalorder %s1238_s19, %s1238_s19 }
  0x25   : > { %p1241_p9 = pnand %p1239_p7, %p1227_p1  ;;  %p1248_p11 = por %p1247_p4, %p1246_p8 }
  0x27   : > { %p1242_p12 = pneg %p1241_p9 }
  0x29   : > { %p1249_p10 = pnand %p1248_p11, %p1242_p12 }
  0x2b   : > { %1252 = shalt.err (!%p1249_p10)
}
  0x2c   : > { %s1371_s21 = smov 128   ;;  %s1372_s23 = smov 8  }
  0x2d   : > { %1160 = dma.hbm_to_vmem [thread:$0]  (!%p1461_p13), %s1632_s1, 3456, %s146_s29, [#allocation3], %s1371_s21, %s1371_s21, %s1372_s23  }
  0x2e   : > { %s1253_s8 = scalar_lea.hbm %s1633_s2, 2048 }
  0x2f   : > { %p1254_p0 = scmp.ne.s32.totalorder %s1633_s2, %s1253_s8  ;;  %p1260_p10 = scmp.lt.u32.totalorder %s1253_s8, %s1633_s2 }
  0x31   : > { %p1256_p4 = pnand %p1254_p0, %p1227_p1 }
  0x33   : > { %p1257_p8 = pneg %p1256_p4 }
  0x35   : > { %p1262_p11 = pnand %p1260_p10, %p1257_p8 }
  0x37   : > { %1265 = shalt.err (!%p1262_p11)
}
  0x38   : > { %s1266_s29 = scalar_lea.vmem %s1465_s5, 2048  ;;  %p1274_p6 = scmp.lt.s32.totalorder %s1465_s5, %s1465_s5 }
  0x39   : > { %p1267_p2 = scmp.ne.s32.totalorder %s1465_s5, %s1266_s29  ;;  %p1275_p7 = scmp.lt.s32.totalorder %s1266_s29, %s1266_s29 }
  0x3b   : > { %p1269_p3 = pnand %p1267_p2, %p1227_p1  ;;  %p1276_p9 = por %p1275_p7, %p1274_p6 }
  0x3d   : > { %p1270_p5 = pneg %p1269_p3 }
  0x3f   : > { %p1277_p12 = pnand %p1276_p9, %p1270_p5 }
  0x41   : > { %1280 = shalt.err (!%p1277_p12)
}
  0x42   : > { %1163 = dma.hbm_to_vmem [thread:$0]  (!%p1461_p13), %s1633_s2, 2048, %s1465_s5, [#allocation6], %s1371_s21, %s1371_s21, %s1372_s23  }
  0x43   : > { %p1644_p0 = scmp.ne.s32.totalorder %s1641_s26, 0 }
  0x44   : > { %p1645_p4 = scmp.ne.s32.totalorder (!%p1644_p0), %s1642_s27, 0 }
  0x45   : > { %186 = sbr.rel (%p1644_p0) target bundleno = 624 (0x270), region = 32 }
  0x4c   : > { %1334 = dma.done.wait (%p1645_p4), [#allocation3], 3456  }
  0x4d   : > { %1336 = vsyncadd (%p1645_p4), [#allocation3], 4294963840 }
  0x4e   : > { %1338 = dma.done.wait (%p1645_p4), [#allocation6], 2048  }
  0x4f   : > { %1340 = vsyncadd (%p1645_p4), [#allocation6], 4294965248  ;;  %p218_p1 = scmp.lt.s32.totalorder %s1359_s15, 1  ;;  %v241_v0 = vld [vmem:[#allocation2 + $0x48] sm:$0xff]  ;;  %v242_v1 = vld [vmem:[#allocation2 + $0x50] sm:$0xff]  ;;  %vm250_vm0 = vcmask 588800  }
  0x50   : > { %v243_v2 = vld [vmem:[#allocation2 + $0x58] sm:$0xff]  ;;  %v1030_v3 = vpack.c.bf16 %v242_v1, %v241_v0  ;;  %v244_v4 = vld [vmem:[#allocation2 + $0x60] sm:$0xff]  ;;  %v245_v6 = vld [vmem:[#allocation2 + $0x68] sm:$0xff]  ;;  %s215_s27 = sand.u32 1, %s1351_s13   ;;  %s825_s6 = sshll.u32 %s1359_s15, 5  ;;  %vm690_vm1 = vcmask 1040384  }
  0x51   : > { %s219_s30 = scalar_select %p218_p1, %s1359_s15, 1  ;;  %v1034_v5 = vpack.c.bf16 %v244_v4, %v243_v2  ;;  %v246_v7 = vld [vmem:[#allocation2 + $0x70] sm:$0xff]  ;;  %v247_v10 = vld [vmem:[#allocation2 + $0x78] sm:$0xff]  ;;  %v248_v11 = vld [vmem:[#allocation2 + $0x80] sm:$0xff] }
  0x52   : > { %1031 = vmatprep.subr.bf16.mxu0 %v1030_v3  ;;  %v1038_v9 = vpack.c.bf16 %v246_v7, %v245_v6  ;;  %v1042_v12 = vpack.c.bf16 %v248_v11, %v247_v10  ;;  %v508_v13 = vld [vmem:[#allocation5] sm:$0xff]  ;;  %v509_v14 = vld [vmem:[#allocation5 + $0x8] sm:$0xff]  ;;  %v510_v15 = vld [vmem:[#allocation5 + $0x10] sm:$0xff]  ;;  %s816_s4 = sshll.u32 %s215_s27, 1  ;;  %s1584_s11 = scalar_lea.hbm %s1634_s3, %s825_s6 }
  0x53   : > { %s1146_s5 = smul.u32 24, %s219_s30  ;;  %1033 = vmatpush3.bf16.msra.mxu0 %v1030_v3  ;;  %v1533_v16 = vpack.c.bf16 %v509_v14, %v508_v13  ;;  %v511_v17 = vld [vmem:[#allocation5 + $0x18] sm:$0xff]  ;;  %v512_v19 = vld [vmem:[#allocation5 + $0x20] sm:$0xff]  ;;  %v513_v20 = vld [vmem:[#allocation5 + $0x28] sm:$0xff]  ;;  %s217_s7 = scalar_lea.vmem [#allocation7], %s816_s4 }
  0x54   : > { %1035 = vmatprep.subr.bf16.mxu0 %v1034_v5  ;;  %v1535_v18 = vpack.c.bf16 %v511_v17, %v510_v15  ;;  %v249_v21 = vld [vmem:[#allocation2 + $0x88] sm:$0xff]  ;;  %v229_v22 = vld [vmem:[#allocation2] sm:$0xff]  ;;  %v231_v24 = vld [vmem:[#allocation2 + $0x10] sm:$0xff]  ;;  %v1540_v26 = vpack.c.bf16 %v513_v20, %v512_v19  ;;  %s708_s8 = sshll.u32 %s217_s7, 4  ;;  %s694_s18 = scalar_lea.sflag [#allocation4], %s215_s27  ;;  %s1586_s8 = int_to_ptr.vmem [resolvable:$true] %s708_s8 }
  0x55   : > { %s1529_s23 = scalar_lea.vmem %s1631_s0, %s1146_s5  ;;  %v230_v23 = vld [vmem:[#allocation2 + $0x8] sm:$0xff]  ;;  %1079 = vmatprep.subr.bf16.mxu1 %v1533_v16  ;;  %v232_v25 = vld [vmem:[#allocation2 + $0x18] sm:$0xff]  ;;  %v515_v29 = vld [vmem:[#allocation5 + $0x38] sm:$0xff]  ;;  %s1281_s29 = scalar_lea.vmem %s1586_s8, 32 }
  0x56   : > { %v238_v8 = vld [vmem:[%s1529_s23 + $0x1] sm:$0xff]  ;;  %1081 = vmatpush3.bf16.msra.mxu1 %v1533_v16  ;;  %v1046_v27 = vpack.c.bf16 %v230_v23, %v229_v22  ;;  %v514_v28 = vld [vmem:[#allocation5 + $0x30] sm:$0xff]  ;;  %v239_v30 = vld [vmem:[%s1529_s23 + $0x9] sm:$0xff]  ;;  %v1050_v31 = vpack.c.bf16 %v232_v25, %v231_v24  ;;  %p1282_p13 = scmp.ne.s32.totalorder %s1586_s8, %s1281_s29  ;;  %p1646_p8 = scmp.ne.s32.totalorder %s1639_s22, 0 }
  0x57   : > { %915 = vmatprep.mubr.msk.f32.mxu0 %vm250_vm0, %v238_v8  ;;  %1037 = vmatpush3.bf16.msra.mxu0 %v1034_v5  ;;  %v227_v32 = vld [vmem:[%s1529_s23] sm:$0xff]  ;;  %v233_v33 = vld [vmem:[#allocation2 + $0x20] sm:$0xff]  ;;  %v234_v34 = vld [vmem:[#allocation2 + $0x28] sm:$0xff]  ;;  %v1546_v35 = vpack.c.bf16 %v515_v29, %v514_v28  ;;  %s1373_s15 = smov [#allocation7]  }
  0x58   : > { %1039 = vmatprep.subr.bf16.mxu0 %v1038_v9  ;;  %1083 = vmatprep.subr.bf16.mxu1 %v1535_v18  ;;  %v516_v36 = vld [vmem:[#allocation5 + $0x40] sm:$0xff]  ;;  %v517_v37 = vld [vmem:[#allocation5 + $0x48] sm:$0xff]  ;;  %v1054_v38 = vpack.c.bf16 %v234_v34, %v233_v33  ;;  %v235_v39 = vld [vmem:[#allocation2 + $0x30] sm:$0xff]  ;;  %p1283_p10 = pnand %p1282_p13, %p1646_p8  ;;  %s1285_s19 = sshll.u32 %s1373_s15, 4  ;;  %s1286_s19 = int_to_ptr.vmem [resolvable:$false] %s1285_s19 }
  0x59   : > { %v236_v40 = vld [vmem:[#allocation2 + $0x38] sm:$0xff]  ;;  %v1552_v41 = vpack.c.bf16 %v517_v37, %v516_v36  ;;  %v518_v42 = vld [vmem:[#allocation5 + $0x50] sm:$0xff]  ;;  %v519_v43 = vld [vmem:[#allocation5 + $0x58] sm:$0xff]  ;;  %s1287_s28 = scalar_lea.vmem %s1286_s19, 64  ;;  %p1288_p2 = scmp.lt.s32.totalorder %s1586_s8, %s1286_s19 }
  0x5a   : > { %1085 = vmatpush3.bf16.msra.mxu1 %v1535_v18  ;;  %v1058_v44 = vpack.c.bf16 %v236_v40, %v235_v39  ;;  %v1556_v45 = vpack.c.bf16 %v519_v43, %v518_v42  ;;  %v520_v46 = vld [vmem:[#allocation5 + $0x60] sm:$0xff]  ;;  %v521_v47 = vld [vmem:[#allocation5 + $0x68] sm:$0xff]  ;;  %v416_v49 = vld [vmem:[#allocation2 + $0x90] sm:$0xff]  ;;  %p1284_p11 = pneg %p1283_p10  ;;  %p1289_p3 = scmp.lt.s32.totalorder %s1287_s28, %s1281_s29 }
  0x5b   : > { %1041 = vmatpush3.bf16.msra.mxu0 %v1038_v9  ;;  %1087 = vmatprep.subr.bf16.mxu1 %v1540_v26  ;;  %v237_v48 = vld [vmem:[#allocation2 + $0x40] sm:$0xff]  ;;  %v417_v50 = vld [vmem:[#allocation2 + $0x98] sm:$0xff]  ;;  %v1102_v51 = vpack.c.bf16 %v521_v47, %v520_v46  ;;  %v419_v53 = vld [vmem:[#allocation2 + $0xa8] sm:$0xff] }
  0x5c   : > { %1043 = vmatprep.subr.bf16.mxu0 %v1042_v12  ;;  %v418_v52 = vld [vmem:[#allocation2 + $0xa0] sm:$0xff]  ;;  %v1062_v54 = vpack.c.bf16 %v417_v50, %v416_v49  ;;  %v522_v55 = vld [vmem:[#allocation5 + $0x70] sm:$0xff]  ;;  %v523_v56 = vld [vmem:[#allocation5 + $0x78] sm:$0xff]  ;;  %p1290_p5 = por %p1289_p3, %p1288_p2 }
  0x5d   : > { %v228_v57 = vld [vmem:[%s1529_s23 + $0x8] sm:$0xff]  ;;  %v1066_v58 = vpack.c.bf16 %v419_v53, %v418_v52  ;;  %v420_v60 = vld [vmem:[#allocation2 + $0xb0] sm:$0xff]  ;;  %v1106_v62 = vpack.c.bf16 %v523_v56, %v522_v55  ;;  %v422_v0 = vld [vmem:[#allocation2 + $0xc0] sm:$0xff] }
  0x5e   : > { %1089 = vmatpush3.bf16.msra.mxu1 %v1540_v26  ;;  %v413_v59 = vld [vmem:[%s1529_s23 + $0x2] sm:$0xff]  ;;  %v423_v1 = vld [vmem:[#allocation2 + $0xc8] sm:$0xff]  ;;  %v414_v4 = vld [vmem:[%s1529_s23 + $0xa] sm:$0xff]  ;;  %p1291_p6 = pnand %p1290_p5, %p1284_p11 }
  0x5f   : > { %1045 = vmatpush3.bf16.msra.mxu0 %v1042_v12  ;;  %1091 = vmatprep.subr.bf16.mxu1 %v1546_v35  ;;  %v421_v61 = vld [vmem:[#allocation2 + $0xb8] sm:$0xff]  ;;  %v1074_v2 = vpack.c.bf16 %v423_v1, %v422_v0  ;;  %v424_v3 = vld [vmem:[#allocation2 + $0xd0] sm:$0xff] }
  0x60   : > { %913 = vmatprep.subr.mxu0 %v249_v21  ;;  %v1070_v63 = vpack.c.bf16 %v421_v61, %v420_v60 }
  0x62   : > { %1093 = vmatpush3.bf16.msra.mxu1 %v1546_v35 }
  0x63   : > { %914 = vmatpush3.msra.mxu0 %v249_v21  ;;  %1095 = vmatprep.subr.bf16.mxu1 %v1552_v41 }
  0x64   : > { %1047 = vmatprep.subr.bf16.mxu0 %v1046_v27  ;;  %916 = vmatmul.mubr.msk.f32.vlgmr.msra.gmra.mrb[0].mxu0 %vm250_vm0, %v239_v30 }
  0x65   : > { %1049 = vmatpush3.bf16.msra.mxu0 %v1046_v27  ;;  %936 = vmatprep.mubr.msk.f32.mxu0 %vm250_vm0, %v227_v32 }
  0x66   : > { %1051 = vmatprep.subr.bf16.mxu0 %v1050_v31  ;;  %1097 = vmatpush3.bf16.msra.mxu1 %v1552_v41 }
  0x67   : > { %1099 = vmatprep.subr.bf16.mxu1 %v1556_v45 }
  0x69   : > { %1053 = vmatpush3.bf16.msra.mxu0 %v1050_v31 }
  0x6a   : > { %1055 = vmatprep.subr.bf16.mxu0 %v1054_v38  ;;  %1101 = vmatpush3.bf16.msra.mxu1 %v1556_v45 }
  0x6b   : > { %1103 = vmatprep.subr.bf16.mxu1 %v1102_v51 }
  0x6d   : > { %1057 = vmatpush3.bf16.msra.mxu0 %v1054_v38 }
  0x6e   : > { %1059 = vmatprep.subr.bf16.mxu0 %v1058_v44  ;;  %1105 = vmatpush3.bf16.msra.mxu1 %v1102_v51 }
  0x6f   : > { %1107 = vmatprep.subr.bf16.mxu1 %v1106_v62 }
  0x71   : > { %1061 = vmatpush3.bf16.msra.mxu0 %v1058_v44 }
  0x72   : > { %934 = vmatprep.subr.mxu0 %v237_v48  ;;  %1109 = vmatpush3.bf16.msra.mxu1 %v1106_v62 }
  0x73   : > { %1111 = vmatprep.subr.bf16.mxu1 %v1533_v16 }
  0x75   : > { %935 = vmatpush3.msra.mxu0 %v237_v48 }
  0x76   : > { %1063 = vmatprep.subr.bf16.mxu0 %v1062_v54  ;;  %937 = vmatmul.mubr.msk.f32.vlgmr.msra.gmra.mrb[0].mxu0 %vm250_vm0, %v228_v57 }
  0x77   : > { %1065 = vmatpush3.bf16.msra.mxu0 %v1062_v54  ;;  %957 = vmatprep.mubr.msk.f32.mxu0 %vm250_vm0, %v413_v59 }
  0x78   : > { %1067 = vmatprep.subr.bf16.mxu0 %v1066_v58 }
  0x7b   : > { %1069 = vmatpush3.bf16.msra.mxu0 %v1066_v58 }
  0x7c   : > { %1071 = vmatprep.subr.bf16.mxu0 %v1070_v63 }
  0x7f   : > { %1073 = vmatpush3.bf16.msra.mxu0 %v1070_v63 }
  0x80   : > { %1075 = vmatprep.subr.bf16.mxu0 %v1074_v2 }
  0x83   : > { %1077 = vmatpush3.bf16.msra.mxu0 %v1074_v2 }
  0x84   : > { %955 = vmatprep.subr.mxu0 %v424_v3 }
  0x87   : > { %956 = vmatpush3.msra.mxu0 %v424_v3 }
  0x88   : > { %958 = vmatmul.mubr.msk.f32.vlgmr.msra.gmra.mrb[0].mxu0 %vm250_vm0, %v414_v4 }
 0x15b   : > { %v959_v5 = vpop.f32.mrb[0].mxu0 }
 0x15c   : > { %v497_v6 = vpop.f32.mrb[1].mxu0  ;;  %v607_v8 = vmul.f32 %v959_v5, %v959_v5 }
 0x15d   : > { %v606_v7 = vmul.f32 %v497_v6, %v497_v6  ;;  %992 = vmatprep.mubr.f32.mxu1 %v497_v6 }
 0x15e   : > { %993 = vmatmul.mubr.f32.vlgmr.msra.gmra.mrb[0].mxu1 %v959_v5 }
 0x15f   : > { %1113 = vmatpush3.bf16.msra.mxu1 %v1533_v16  ;;  %1027 = vmatprep.mubr.f32.mxu1 %v606_v7 }
 0x160   : > { %1115 = vmatprep.subr.bf16.mxu1 %v1535_v18 }
 0x163   : > { %1117 = vmatpush3.bf16.msra.mxu1 %v1535_v18 }
 0x164   : > { %1119 = vmatprep.subr.bf16.mxu1 %v1540_v26 }
 0x167   : > { %1121 = vmatpush3.bf16.msra.mxu1 %v1540_v26 }
 0x168   : > { %1123 = vmatprep.subr.bf16.mxu1 %v1546_v35 }
 0x16b   : > { %1125 = vmatpush3.bf16.msra.mxu1 %v1546_v35 }
 0x16c   : > { %1127 = vmatprep.subr.bf16.mxu1 %v1552_v41 }
 0x16f   : > { %1129 = vmatpush3.bf16.msra.mxu1 %v1552_v41 }
 0x170   : > { %1131 = vmatprep.subr.bf16.mxu1 %v1556_v45 }
 0x173   : > { %1133 = vmatpush3.bf16.msra.mxu1 %v1556_v45 }
 0x174   : > { %1135 = vmatprep.subr.bf16.mxu1 %v1102_v51 }
 0x177   : > { %1137 = vmatpush3.bf16.msra.mxu1 %v1102_v51 }
 0x178   : > { %1139 = vmatprep.subr.bf16.mxu1 %v1106_v62 }
 0x17b   : > { %1141 = vmatpush3.bf16.msra.mxu1 %v1106_v62 }
 0x17e   : > { %1028 = vmatmul.mubr.f32.vlgmr.msra.gmra.mrb[2].mxu1 %v607_v8 }
 0x231   : > { %v994_v9 = vpop.f32.mrb[0].mxu1 }
 0x232   : > { %v590_v10 = vpop.f32.mrb[1].mxu1 }
 0x233   : > { %v599_v11 = vadd.f32 %v994_v9, %v590_v10 }
 0x235   : > { %v600_v12 = vrot.slane %v599_v11, 4 }
 0x237   : > { %v601_v13 = vadd.f32 %v600_v12, %v599_v11 }
 0x239   : > { %v602_v16 = vrot.slane %v601_v13, 2 }
 0x23b   : > { %v603_v19 = vadd.f32 %v602_v16, %v601_v13 }
 0x23d   : > { %v604_v22 = vrot.slane %v603_v19, 1 }
 0x23f   : > { %v605_v25 = vadd.f32 %v604_v22, %v603_v19 }
 0x251   : > { %v1029_v14 = vpop.f32.mrb[2].mxu1 }
 0x252   : > { %v674_v15 = vpop.f32.mrb[3].mxu1 }
 0x253   : > { %v683_v17 = vadd.f32 %v1029_v14, %v674_v15 }
 0x255   : > { %v684_v18 = vrot.slane %v683_v17, 4 }
 0x257   : > { %v685_v20 = vadd.f32 %v684_v18, %v683_v17 }
 0x259   : > { %v686_v21 = vrot.slane %v685_v20, 2 }
 0x25b   : > { %v687_v23 = vadd.f32 %v686_v21, %v685_v20 }
 0x25d   : > { %v688_v24 = vrot.slane %v687_v23, 1 }
 0x25f   : > { %v689_v26 = vadd.f32 %v688_v24, %v687_v23 }
 0x261   : > { %v691_v27 = vsel %vm690_vm1, %v605_v25, %v689_v26 }
 0x262   : > { %692 = vst [vmem:[%s217_s7] sm:$0x3] %v691_v27 }
 0x263   : > { %1294 = shalt.err (!%p1291_p6)
}
 0x264   : > { %s1295_s30 = scalar_lea.hbm %s1584_s11, 32  ;;  %s1299_s21 = scalar_lea.hbm %s1634_s3, 64 }
 0x265   : > { %p1296_p7 = scmp.ne.s32.totalorder %s1584_s11, %s1295_s30  ;;  %p1300_p0 = scmp.lt.u32.totalorder %s1584_s11, %s1634_s3 }
 0x266   : > { %p1301_p4 = scmp.lt.u32.totalorder %s1299_s21, %s1295_s30  ;;  %p1303_p13 = scmp.lt.u32.totalorder %s1295_s30, %s1584_s11 }
 0x267   : > { %p1297_p9 = pnand %p1296_p7, %p1646_p8 }
 0x268   : > { %p1302_p1 = por %p1301_p4, %p1300_p0 }
 0x269   : > { %p1298_p12 = pneg %p1297_p9 }
 0x26a   : > { %p1304_p10 = por %p1303_p13, %p1302_p1 }
 0x26c   : > { %p1305_p11 = pnand %p1304_p10, %p1298_p12 }
 0x26e   : > { %1308 = shalt.err (!%p1305_p11)
}
 0x26f   : > { %1155 = dma.vmem_to_hbm [thread:$0]  (%p1646_p8), %s1586_s8, 32, %s1584_s11, %s694_s18  }
 0x270 PF: > { %p1172_p2 = scmp.ge.s32.totalorder %s1367_s17, 2  ;;  %s720_s4 = sand.u32 1, %s1347_s12  }
 0x271   : > { %p1647_p3 = scmp.ne.s32.totalorder %s1640_s24, 0  ;;  %s721_s6 = scalar_lea.sflag [#allocation4], %s720_s4 }
 0x273   : > { %p1165_p5 = pnand %p1172_p2, %p1647_p3 }
 0x275   : > { %1342 = dma.done.wait (!%p1165_p5), %s721_s6, 32  }
 0x276   : > { %1344 = vsyncadd (!%p1165_p5), %s721_s6, 4294967264  ;;  %s18_s17 = sadd.s32 1, %s1367_s17   ;;  %s1648_s12 = smov %s1351_s13 }
 0x277   : > { %p15_p6 = scmp.ge.s32.totalorder %s18_s17, 4   ;;  %s1649_s13 = smov %s1355_s14 }
 0x278   : > { %s1650_s14 = smov %s1447_s25  ;;  %s1651_s15 = smov %s1363_s16 }
 0x279   : > { %s1652_s16 = smov %s1654_s20  ;;  %17 = sbr.rel (!%p15_p6) target bundleno = 6 (0x6), region = 78 }
 0x280   :  { %726 = vsyncpa [#allocation3], 1 }
 0x281   :  { %728 = vsyncpa [#allocation3 + $0x1], 1 }
 0x282   :  { %729 = vsyncpa [#allocation6], 1 }
 0x283   :  { %730 = vsyncpa [#allocation4], 1 }
 0x284   :  { %732 = vsyncpa [#allocation4 + $0x1], 1 }

</bundles_post_ra>
